<compile_context>
chip_gen: v7x
topology: tpu7x:2x2x1
jax: 0.10.0
libtpu: 0.0.40
codegen_flags: <defaults>
</compile_context>

<pallas_src>
import math
import functools

import jax
import jax.numpy as jnp
from jax import lax
from jax.experimental import pallas as pl
from jax.experimental.pallas import tpu as pltpu

_INV_SQRT2 = 1.0 / math.sqrt(2.0)


def _ff_kernel(x_ref, w_in_ref, w_out_ref, o_ref, carry_ref, *,
               inner_dim, hw, bb, enable_time):
    """One grid step: a (bb, C, tile) slab of the flattened (B, C, T*H*W) input.

    x_ref    : (bb, C, tile)        input block (channels on sublanes, THW on lanes)
    w_in_ref : (2*inner, C)         proj_in conv weight
    w_out_ref: (C, inner)           proj_out conv weight with ChanLayerNorm gain folded in
    o_ref    : (bb, C, tile)        output block (lane-dense store)
    carry_ref: (bb, inner//2, hw)   last-frame gate-half of the previous THW tile
    """
    t_idx = pl.program_id(1)
    half = inner_dim // 2
    inv_inner = 1.0 / float(inner_dim)

    w_in = w_in_ref[...].astype(jnp.float32)                  # (2*inner, C)
    w_out = w_out_ref[...].astype(jnp.float32)                # (C, inner)
    # Row sums used to fold the "- mean" of ChanLayerNorm after the matmul.
    w_out_rowsum = jnp.sum(w_out, axis=1, keepdims=True)      # (C, 1)

    if enable_time:
        # First THW tile of each batch block: frame t-1 of the first frame is zeros.
        @pl.when(t_idx == 0)
        def _reset_carry():
            carry_ref[...] = jnp.zeros_like(carry_ref)

    def one_batch(b, carry):
        x = x_ref[b].astype(jnp.float32)                      # (C, tile)
        tile_lanes = x.shape[1]

        # proj_in 1x1x1 conv == matmul on the MXU.
        h = jnp.dot(w_in, x, preferred_element_type=jnp.float32)   # (2*inner, tile)
        a = h[:inner_dim]                                     # 8-aligned sublane slices
        gate = h[inner_dim:]
        # GEGLU with exact (erf) GELU, computed in fp32 like torch's `.float()`.
        geglu = a * (0.5 * gate * (1.0 + lax.erf(gate * _INV_SQRT2)))

        if enable_time:
            # shift_token: first half channels unchanged, second half comes from
            # frame t-1.  Time is the major factor of the flattened lane axis, so
            # "previous frame" == previous hw lanes; the frame preceding this tile
            # lives in the carry scratch (zeros at t=0).
            g1 = geglu[:half]                                 # (half, tile)
            g2 = geglu[half:]
            prev = carry_ref[b]                               # (half, hw)
            carry_ref[b] = g2[:, tile_lanes - hw:]            # save for the next tile
            if tile_lanes > hw:
                g2s = jnp.concatenate([prev, g2[:, :tile_lanes - hw]], axis=1)
            else:                                             # single frame per tile
                g2s = prev

            # ChanLayerNorm statistics over channels, one pass, no concat temporary.
            s1 = (jnp.sum(g1, axis=0, keepdims=True)
                  + jnp.sum(g2s, axis=0, keepdims=True))      # (1, tile)
            s2 = (jnp.sum(g1 * g1, axis=0, keepdims=True)
                  + jnp.sum(g2s * g2s, axis=0, keepdims=True))
            # proj_out matmul split over the two halves (avoids materializing [g1; g2s]).
            yw = (jnp.dot(w_out[:, :half], g1, preferred_element_type=jnp.float32)
                  + jnp.dot(w_out[:, half:], g2s, preferred_element_type=jnp.float32))
        else:
            s1 = jnp.sum(geglu, axis=0, keepdims=True)
            s2 = jnp.sum(geglu * geglu, axis=0, keepdims=True)
            yw = jnp.dot(w_out, geglu, preferred_element_type=jnp.float32)

        mean = s1 * inv_inner                                 # (1, tile)
        var = s2 * inv_inner - mean * mean                    # biased variance
        rstd = lax.rsqrt(jnp.maximum(var, 1e-5))              # var.clamp(1e-5).rsqrt()
        # w_out @ ((y - mean) * rstd)  ==  (w_out @ y - rowsum(w_out) * mean) * rstd
        out = (yw - w_out_rowsum * mean) * rstd               # (C, tile), lane-dense
        o_ref[b] = out.astype(o_ref.dtype)
        return carry

    lax.fori_loop(0, bb, one_batch, None, unroll=True)


def _choose_thw_tile(thw, hw, c, inner):
    """Lane-axis tile: multiple of H*W and 128, dividing THW, under a VMEM budget."""
    budget_bytes = 12 * 1024 * 1024          # f32 lane-resident intermediates per step
    bytes_per_lane = 4 * (4 * inner + 4 * c)  # h + geglu temporaries + x/out blocks
    max_lanes = max(1, budget_bytes // bytes_per_lane)
    if thw <= max_lanes:
        return thw
    step = hw * 128 // math.gcd(hw, 128)      # multiple of both H*W and 128
    tile = (max_lanes // step) * step
    while tile >= step and thw % tile:
        tile -= step
    if tile < step or thw % tile:
        # TODO(synk): THW not tileable on 128-aligned frame boundaries — fall back to
        # a single (possibly large) block.
        return thw
    return tile


def _choose_batch_block(batch, c, tile):
    """Batch elements per block: amortize step overhead, keep >=2 grid steps (v7x)."""
    budget_bytes = 8 * 1024 * 1024
    per_b = 2 * (2 * c * tile * 4)            # in + out blocks, double-buffered, f32
    bb = max(1, min(batch, budget_bytes // max(per_b, 1)))
    if batch >= 2:
        bb = min(bb, max(1, batch // 2))      # keep at least 2 blocks on the parallel axis
    while bb > 1 and batch % bb:
        bb -= 1
    return max(bb, 1)


def feed_forward(x_ncdhw, w_in, g, w_out, enable_time=True):
    """FeedForward forward pass.

    x_ncdhw: (B, C, T, H, W) — PyTorch NCDHW layout.
    w_in :   (2*inner, C)    — squeezed Conv3d(dim, 2*inner, 1) weight (PyTorch layout).
    g    :   (inner,)        — ChanLayerNorm gain.
    w_out:   (C, inner)      — squeezed Conv3d(inner, dim, 1) weight (PyTorch layout).
    """
    B, C, T, H, W = x_ncdhw.shape
    two_inner = w_in.shape[0]
    inner = two_inner // 2
    half = inner // 2
    HW = H * W
    THW = T * HW

    # Free, contiguous reshape — no transpose, no extra HBM traffic.
    x = x_ncdhw.reshape(B, C, THW)
    # Fold the ChanLayerNorm gain into the output projection (per-input-channel scale).
    w_out_scaled = (w_out * g[None, :]).astype(jnp.float32)

    tile = _choose_thw_tile(THW, HW, C, inner)
    bb = _choose_batch_block(B, C, tile)
    nb = B // bb
    nt = THW // tile

    kernel = functools.partial(_ff_kernel, inner_dim=inner, hw=HW, bb=bb,
                               enable_time=enable_time)
    out = pl.pallas_call(
        kernel,
        out_shape=jax.ShapeDtypeStruct((B, C, THW), jnp.float32),
        grid=(nb, nt),
        in_specs=[
            pl.BlockSpec((bb, C, tile), lambda b, t: (b, 0, t)),
            # Weights: constant block index across the grid -> resident in VMEM.
            # (pipeline_mode=pl.Buffered(1) skipped: saving is ~18 KB, not worth
            #  compile risk at these weight sizes.)
            pl.BlockSpec((two_inner, C), lambda b, t: (0, 0)),
            pl.BlockSpec((C, inner), lambda b, t: (0, 0)),
        ],
        out_specs=pl.BlockSpec((bb, C, tile), lambda b, t: (b, 0, t)),
        scratch_shapes=[pltpu.VMEM((bb, half, HW), jnp.float32)],
        compiler_params=pltpu.CompilerParams(
            dimension_semantics=("parallel", "arbitrary"),
            vmem_limit_bytes=32 * 1024 * 1024),
    )(x, w_in, w_out_scaled)

    return out.reshape(B, C, T, H, W)


def ref_feed_forward(x, w_in, g, w_out, enable_time=True):
    """Pure-JAX reference mirroring the PyTorch FeedForward module."""
    T = x.shape[2]
    inner = w_out.shape[1]
    h = jnp.einsum('oc,bcthw->bothw', w_in, x.astype(jnp.float32))
    a, gate = h[:, :inner], h[:, inner:]
    geglu = a * jax.nn.gelu(gate, approximate=False)
    if enable_time:
        half = inner // 2
        t1, t2 = geglu[:, :half], geglu[:, half:]
        t2 = jnp.pad(t2, ((0, 0), (0, 0), (1, 0), (0, 0), (0, 0)))[:, :, :T]
        geglu = jnp.concatenate([t1, t2], axis=1)
    mean = jnp.mean(geglu, axis=1, keepdims=True)
    var = jnp.mean((geglu - mean) ** 2, axis=1, keepdims=True)
    normed = (geglu - mean) * lax.rsqrt(jnp.maximum(var, 1e-5))
    normed = normed * g.reshape(1, inner, 1, 1, 1)
    return jnp.einsum('oc,bcthw->bothw', w_out, normed)


if __name__ == "__main__":
    # Module config: dim=24, mult=4  ->  inner_dim = int(24*4*2/3) = 64
    dim, mult = 24, 4
    inner = int(dim * mult * 2 / 3)
    B, T, H, W = 2, 4, 8, 8

    key = jax.random.PRNGKey(0)
    kx, k1, k2, kg = jax.random.split(key, 4)

    x = jax.random.normal(kx, (B, dim, T, H, W), dtype=jnp.float32)
    # Conv3d(dim, 2*inner, 1) weight squeezed: (2*inner, dim)
    w_in = jax.random.normal(k1, (2 * inner, dim), dtype=jnp.float32) * 0.1
    # Conv3d(inner, dim, 1) weight squeezed: (dim, inner)
    w_out = jax.random.normal(k2, (dim, inner), dtype=jnp.float32) * 0.1
    # ChanLayerNorm g (init ones in the module; perturbed here to exercise the path).
    g = 1.0 + 0.05 * jax.random.normal(kg, (inner,), dtype=jnp.float32)

    # enable_time=True path (default in the module)
    out = jax.block_until_ready(feed_forward(x, w_in, g, w_out, enable_time=True))
    ref = jax.block_until_ready(ref_feed_forward(x, w_in, g, w_out, enable_time=True))
    assert out.shape == (B, dim, T, H, W)
    err = float(jnp.max(jnp.abs(out - ref)))
    assert err < 1e-3, f"mismatch vs reference (enable_time=True): {err}"

    # enable_time=False path
    out_nt = jax.block_until_ready(feed_forward(x, w_in, g, w_out, enable_time=False))
    ref_nt = jax.block_until_ready(ref_feed_forward(x, w_in, g, w_out, enable_time=False))
    err_nt = float(jnp.max(jnp.abs(out_nt - ref_nt)))
    assert err_nt < 1e-3, f"mismatch vs reference (enable_time=False): {err_nt}"

    print("KERNEL_OK")
</pallas_src>

<mosaic_0001>
module attributes {stable_mosaic.version = 11 : i64} {
  func.func @_ff_kernel(%arg0: i32, %arg1: i32, %arg2: memref<1x24x256xf32, #tpu.memory_space<vmem>>, %arg3: memref<128x24xf32, #tpu.memory_space<vmem>>, %arg4: memref<24x64xf32, #tpu.memory_space<vmem>>, %arg5: memref<1x24x256xf32, #tpu.memory_space<vmem>>, %arg6: memref<1x32x64xf32, #tpu.memory_space<vmem>>) attributes {dimension_semantics = [#tpu.dimension_semantics<parallel>, #tpu.dimension_semantics<arbitrary>], iteration_bounds = array<i64: 2, 1>, scalar_prefetch = 0 : i64, scratch_operands = 1 : i64, tpu.core_type = #tpu.core_type<tc>, window_params = [{transform_indices = @transform_0, window_bounds = array<i64: 1, 24, 256>}, {pipeline_mode = #tpu.pipeline_mode<synchronous>, transform_indices = @transform_1, window_bounds = array<i64: 128, 24>}, {pipeline_mode = #tpu.pipeline_mode<synchronous>, transform_indices = @transform_2, window_bounds = array<i64: 24, 64>}, {transform_indices = @transform_3, window_bounds = array<i64: 1, 24, 256>}]} {
    %c0 = arith.constant 0 : index
    %c0_0 = arith.constant 0 : index
    %0 = vector.load %arg3[%c0, %c0_0] : memref<128x24xf32, #tpu.memory_space<vmem>>, vector<128x24xf32>
    %c0_1 = arith.constant 0 : index
    %c0_2 = arith.constant 0 : index
    %1 = vector.load %arg4[%c0_1, %c0_2] : memref<24x64xf32, #tpu.memory_space<vmem>>, vector<24x64xf32>
    %cst = arith.constant dense<0.000000e+00> : vector<24xf32>
    %2 = vector.multi_reduction <add>, %1, %cst [1] : vector<24x64xf32> to vector<24xf32>
    %3 = vector.shape_cast %2 : vector<24xf32> to vector<24x1xf32>
    %c0_i32 = arith.constant 0 : i32
    %4 = arith.cmpi eq, %arg1, %c0_i32 : i32
    %5 = arith.extui %4 : i1 to i32
    %c0_i32_3 = arith.constant 0 : i32
    %6 = arith.cmpi ne, %5, %c0_i32_3 : i32
    scf.if %6 {
      %cst_26 = arith.constant 0.000000e+00 : f32
      %70 = vector.broadcast %cst_26 : f32 to vector<1x32x64xf32>
      %c0_27 = arith.constant 0 : index
      %c0_28 = arith.constant 0 : index
      %c0_29 = arith.constant 0 : index
      %71 = vector.load %arg6[%c0_27, %c0_28, %c0_29] : memref<1x32x64xf32, #tpu.memory_space<vmem>>, vector<1x32x64xf32>
      tpu.vector_store %arg6[%c0_27, %c0_28, %c0_29], %70 {strides = array<i32>} : memref<1x32x64xf32, #tpu.memory_space<vmem>>, vector<1x32x64xf32>,
    } else {
    }
    %c0_i32_4 = arith.constant 0 : i32
    %7 = arith.index_cast %c0_i32_4 : i32 to index
    %c0_5 = arith.constant 0 : index
    %c0_6 = arith.constant 0 : index
    %8 = vector.load %arg2[%7, %c0_5, %c0_6] : memref<1x24x256xf32, #tpu.memory_space<vmem>>, vector<1x24x256xf32>
    %9 = vector.shape_cast %8 : vector<1x24x256xf32> to vector<24x256xf32>
    %cst_7 = arith.constant dense<0.000000e+00> : vector<128x256xf32>
    %10 = tpu.matmul %0, %9, %cst_7 {dimension_numbers = #tpu.dot_dimension_numbers<[1], [0], [0], [1], [0, 0, 1, 1], [], []>} : vector<128x24xf32>, vector<24x256xf32>, vector<128x256xf32> -> vector<128x256xf32>
    %11 = vector.extract_strided_slice %10 {offsets = [0, 0], sizes = [64, 256], strides = [1, 1]} : vector<128x256xf32> to vector<64x256xf32>
    %12 = vector.extract_strided_slice %10 {offsets = [64, 0], sizes = [64, 256], strides = [1, 1]} : vector<128x256xf32> to vector<64x256xf32>
    %cst_8 = arith.constant 5.000000e-01 : f32
    %13 = vector.broadcast %cst_8 : f32 to vector<64x256xf32>
    %14 = arith.mulf %13, %12 : vector<64x256xf32>
    %cst_9 = arith.constant 0.707106769 : f32
    %15 = vector.broadcast %cst_9 : f32 to vector<64x256xf32>
    %16 = arith.mulf %12, %15 : vector<64x256xf32>
    %17 = math.erf %16 : vector<64x256xf32>
    %cst_10 = arith.constant 1.000000e+00 : f32
    %18 = vector.broadcast %cst_10 : f32 to vector<64x256xf32>
    %19 = arith.addf %18, %17 : vector<64x256xf32>
    %20 = arith.mulf %14, %19 : vector<64x256xf32>
    %21 = arith.mulf %11, %20 : vector<64x256xf32>
    %22 = vector.extract_strided_slice %21 {offsets = [0, 0], sizes = [32, 256], strides = [1, 1]} : vector<64x256xf32> to vector<32x256xf32>
    %23 = vector.extract_strided_slice %21 {offsets = [32, 0], sizes = [32, 256], strides = [1, 1]} : vector<64x256xf32> to vector<32x256xf32>
    %24 = arith.index_cast %c0_i32_4 : i32 to index
    %c0_11 = arith.constant 0 : index
    %c0_12 = arith.constant 0 : index
    %25 = vector.load %arg6[%24, %c0_11, %c0_12] : memref<1x32x64xf32, #tpu.memory_space<vmem>>, vector<1x32x64xf32>
    %26 = vector.shape_cast %25 : vector<1x32x64xf32> to vector<32x64xf32>
    %27 = vector.extract_strided_slice %23 {offsets = [0, 192], sizes = [32, 64], strides = [1, 1]} : vector<32x256xf32> to vector<32x64xf32>
    %28 = arith.index_cast %c0_i32_4 : i32 to index
    %c0_13 = arith.constant 0 : index
    %c0_14 = arith.constant 0 : index
    %29 = vector.load %arg6[%28, %c0_13, %c0_14] : memref<1x32x64xf32, #tpu.memory_space<vmem>>, vector<1x32x64xf32>
    %30 = vector.shape_cast %29 : vector<1x32x64xf32> to vector<32x64xf32>
    %31 = vector.shape_cast %27 : vector<32x64xf32> to vector<1x32x64xf32>
    tpu.vector_store %arg6[%28, %c0_13, %c0_14], %31 {strides = array<i32>} : memref<1x32x64xf32, #tpu.memory_space<vmem>>, vector<1x32x64xf32>,
    %32 = vector.extract_strided_slice %23 {offsets = [0, 0], sizes = [32, 192], strides = [1, 1]} : vector<32x256xf32> to vector<32x192xf32>
    %33 = tpu.concatenate %26, %32 in 1 : vector<32x64xf32>, vector<32x192xf32> -> vector<32x256xf32>
    %cst_15 = arith.constant dense<0.000000e+00> : vector<256xf32>
    %34 = vector.multi_reduction <add>, %22, %cst_15 [0] : vector<32x256xf32> to vector<256xf32>
    %35 = vector.shape_cast %34 : vector<256xf32> to vector<1x256xf32>
    %cst_16 = arith.constant dense<0.000000e+00> : vector<256xf32>
    %36 = vector.multi_reduction <add>, %33, %cst_16 [0] : vector<32x256xf32> to vector<256xf32>
    %37 = vector.shape_cast %36 : vector<256xf32> to vector<1x256xf32>
    %38 = arith.addf %35, %37 : vector<1x256xf32>
    %39 = arith.mulf %22, %22 : vector<32x256xf32>
    %cst_17 = arith.constant dense<0.000000e+00> : vector<256xf32>
    %40 = vector.multi_reduction <add>, %39, %cst_17 [0] : vector<32x256xf32> to vector<256xf32>
    %41 = vector.shape_cast %40 : vector<256xf32> to vector<1x256xf32>
    %42 = arith.mulf %33, %33 : vector<32x256xf32>
    %cst_18 = arith.constant dense<0.000000e+00> : vector<256xf32>
    %43 = vector.multi_reduction <add>, %42, %cst_18 [0] : vector<32x256xf32> to vector<256xf32>
    %44 = vector.shape_cast %43 : vector<256xf32> to vector<1x256xf32>
    %45 = arith.addf %41, %44 : vector<1x256xf32>
    %46 = vector.extract_strided_slice %1 {offsets = [0, 0], sizes = [24, 32], strides = [1, 1]} : vector<24x64xf32> to vector<24x32xf32>
    %cst_19 = arith.constant dense<0.000000e+00> : vector<24x256xf32>
    %47 = tpu.matmul %46, %22, %cst_19 {dimension_numbers = #tpu.dot_dimension_numbers<[1], [0], [0], [1], [0, 0, 1, 1], [], []>} : vector<24x32xf32>, vector<32x256xf32>, vector<24x256xf32> -> vector<24x256xf32>
    %48 = vector.extract_strided_slice %1 {offsets = [0, 32], sizes = [24, 32], strides = [1, 1]} : vector<24x64xf32> to vector<24x32xf32>
    %cst_20 = arith.constant dense<0.000000e+00> : vector<24x256xf32>
    %49 = tpu.matmul %48, %33, %cst_20 {dimension_numbers = #tpu.dot_dimension_numbers<[1], [0], [0], [1], [0, 0, 1, 1], [], []>} : vector<24x32xf32>, vector<32x256xf32>, vector<24x256xf32> -> vector<24x256xf32>
    %50 = arith.addf %47, %49 : vector<24x256xf32>
    %cst_21 = arith.constant 1.562500e-02 : f32
    %51 = vector.broadcast %cst_21 : f32 to vector<1x256xf32>
    %52 = arith.mulf %38, %51 : vector<1x256xf32>
    %cst_22 = arith.constant 1.562500e-02 : f32
    %53 = vector.broadcast %cst_22 : f32 to vector<1x256xf32>
    %54 = arith.mulf %45, %53 : vector<1x256xf32>
    %55 = arith.mulf %52, %52 : vector<1x256xf32>
    %56 = arith.subf %54, %55 : vector<1x256xf32>
    %cst_23 = arith.constant 9.99999974E-6 : f32
    %57 = vector.broadcast %cst_23 : f32 to vector<1x256xf32>
    %58 = arith.maximumf %56, %57 : vector<1x256xf32>
    %59 = math.rsqrt %58 : vector<1x256xf32>
    %60 = vector.broadcast %3 : vector<24x1xf32> to vector<24x256xf32>
    %61 = vector.broadcast %52 : vector<1x256xf32> to vector<24x256xf32>
    %62 = arith.mulf %60, %61 : vector<24x256xf32>
    %63 = arith.subf %50, %62 : vector<24x256xf32>
    %64 = vector.broadcast %59 : vector<1x256xf32> to vector<24x256xf32>
    %65 = arith.mulf %63, %64 : vector<24x256xf32>
    %66 = arith.index_cast %c0_i32_4 : i32 to index
    %c0_24 = arith.constant 0 : index
    %c0_25 = arith.constant 0 : index
    %67 = vector.load %arg5[%66, %c0_24, %c0_25] : memref<1x24x256xf32, #tpu.memory_space<vmem>>, vector<1x24x256xf32>
    %68 = vector.shape_cast %67 : vector<1x24x256xf32> to vector<24x256xf32>
    %69 = vector.shape_cast %65 : vector<24x256xf32> to vector<1x24x256xf32>
    tpu.vector_store %arg5[%66, %c0_24, %c0_25], %69 {strides = array<i32>} : memref<1x24x256xf32, #tpu.memory_space<vmem>>, vector<1x24x256xf32>,
    %c1_i32 = arith.constant 1 : i32
    return
  }
  func.func @transform_0(%arg0: i32, %arg1: i32) -> (i32, i32, i32) {
    %c0_i32 = arith.constant 0 : i32
    %c0_i32_0 = arith.constant 0 : i32
    return %arg0, %c0_i32, %arg1 : i32, i32, i32
  }
  func.func @transform_1(%arg0: i32, %arg1: i32) -> (i32, i32) {
    %c0_i32 = arith.constant 0 : i32
    %c0_i32_0 = arith.constant 0 : i32
    %c0_i32_1 = arith.constant 0 : i32
    return %c0_i32, %c0_i32_0 : i32, i32
  }
  func.func @transform_2(%arg0: i32, %arg1: i32) -> (i32, i32) {
    %c0_i32 = arith.constant 0 : i32
    %c0_i32_0 = arith.constant 0 : i32
    %c0_i32_1 = arith.constant 0 : i32
    return %c0_i32, %c0_i32_0 : i32, i32
  }
  func.func @transform_3(%arg0: i32, %arg1: i32) -> (i32, i32, i32) {
    %c0_i32 = arith.constant 0 : i32
    %c0_i32_0 = arith.constant 0 : i32
    return %arg0, %c0_i32, %arg1 : i32, i32, i32
  }
}

</mosaic_0001>

<bundles_post_ra>
// kernel: tpu_custom_call.1
= control target key start
LH: loop header
LB: loop body
LE: loop exit
PB: predicated region body
PF: predicated region fallthrough
CT: control target
= control target key end

     0   :  { %8 = vsyncpa [#allocation4], 0  ;;  %s1622_s0 = inlined_call_operand.vmem [shape: f32[2,24,256], index: 0, kind: input, shape index: {}]   ;;  %s1623_s1 = inlined_call_operand.vmem [shape: f32[128,24], index: 1, kind: input, shape index: {}]   ;;  %s1624_s2 = inlined_call_operand.vmem [shape: f32[24,64], index: 2, kind: input, shape index: {}]   ;;  %s1625_s3 = inlined_call_operand.hbm [shape: f32[2,24,256], index: 3, kind: output, shape index: {}]  }
   0x1   :  { %10 = vsyncpa [#allocation4 + $0x1], 0  ;;  %s1278_s12 = smov 0   ;;  %s1280_s13 = smov 0  }
   0x2   :  { %s1282_s14 = smov 0   ;;  %s1284_s15 = smov 0  }
   0x3   :  { %s1286_s16 = smov 0   ;;  %s1288_s17 = smov 0  }
   0x4 LB: > { %s1012_s18 = sadd.s32 4294967295, %s1250_s17   ;;  %s1013_s19 = sadd.s32 4294967294, %s1250_s17   ;;  %s1250_s17 = sphi %s1288_s17, %s16_s17   ;;  %s1246_s16 = sphi %s1286_s16, %s1632_s16   ;;  %s1242_s15 = sphi %s1284_s15, %s1631_s15   ;;  %s1238_s14 = sphi %s1282_s14, %s1630_s14   ;;  %s1234_s13 = sphi %s1280_s13, %s1629_s13   ;;  %s1230_s12 = sphi %s1278_s12, %s1628_s12  }
   0x5   : > { %s28_s20 = sadd.s32 1, %s1246_s16  ;;  %s107_s21 = sadd.s32 1, %s1238_s14 }
   0x6   : > { %p30_p0 = scmp.ge.s32.totalorder %s28_s20, 2  ;;  %p117_p1 = scmp.ne.s32.totalorder %s1238_s14, %s1234_s13 }
   0x7   : > { %p118_p2 = scmp.eq.s32.totalorder %s1012_s18, 1  ;;  %p123_p3 = scmp.ne.s32.totalorder %s1234_s13, %s1230_s12 }
   0x8   : > { %s1634_s20 = smov (%p30_p0, %s28_s20), 0  ;;  %p124_p5 = scmp.eq.s32.totalorder %s1013_s19, 1 }
   0x9   : > { %p1318_p4 = por %p118_p2, %p117_p1  ;;  %s102_s23 = ssub.s32 %s1246_s16, %s1634_s20 }
   0xa   : > { %p1016_p6 = scmp.ge.s32.totalorder %s1250_s17, 1  ;;  %p105_p7 = scmp.eq.s32.totalorder %s102_s23, 0 }
   0xb   : > { %p1325_p8 = por %p124_p5, %p123_p3  ;;  %p161_p9 = scmp.lt.s32.totalorder %s1250_s17, 3 }
   0xc   : > { %s1331_s25 = scalar_select %p105_p7, %s1238_s14, %s107_s21  }
   0xd   : > { %p162_p10 = pnand %p1016_p6, %p161_p9 }
   0xe   : > { %p190_p11 = scmp.lt.s32.totalorder (!%p162_p10), %s1242_s15, 1  ;;  %v1252_v0 = vmov (!%p162_p10), 0.0   ;;  %v200_v9 = vld [vmem:[%s1623_s1] sm:$0xff] (!%p162_p10)  ;;  %vm243_vm0 = vcmask (!%p162_p10), 195584   ;;  %v211_v10 = vld [vmem:[%s1623_s1 + $0x58] sm:$0xff] (!%p162_p10)  ;;  %v201_v11 = vld [vmem:[%s1623_s1 + $0x8] sm:$0xff] (!%p162_p10) }
   0xf   : > { %165 = sbr.rel (%p162_p10) target bundleno = 663 (0x297), region = 32  ;;  %356 = vmatprep.mubr.f32.mxu0 (!%p162_p10), %v1252_v0  ;;  %422 = vmatprep.mubr.f32.mxu1 (!%p162_p10), %v1252_v0  ;;  %v212_v12 = vld [vmem:[%s1623_s1 + $0x60] sm:$0xff] (!%p162_p10)  ;;  %v202_v13 = vld [vmem:[%s1623_s1 + $0x10] sm:$0xff] (!%p162_p10)  ;;  %v213_v14 = vld [vmem:[%s1623_s1 + $0x68] sm:$0xff] (!%p162_p10)  ;;  %vm219_vm1 = vcmask (!%p162_p10), 523264   ;;  %s1253_s29 = smov (!%p162_p10), 64  }
  0x10   : > { %v203_v15 = vld [vmem:[%s1623_s1 + $0x18] sm:$0xff] (!%p162_p10)  ;;  %v214_v16 = vld [vmem:[%s1623_s1 + $0x70] sm:$0xff] (!%p162_p10)  ;;  %v204_v17 = vld [vmem:[%s1623_s1 + $0x20] sm:$0xff] (!%p162_p10)  ;;  %233 = vst.msk [vmem:[#allocation2] sm:$0xff] (!%p162_p10), %vm219_vm1, %v1252_v0  ;;  %s1254_s5 = smov (!%p162_p10), 96   ;;  %vm702_vm2 = vcmask (!%p162_p10), 261120  }
  0x11   : > { %v215_v18 = vld [vmem:[%s1623_s1 + $0x78] sm:$0xff] (!%p162_p10)  ;;  %v205_v19 = vld [vmem:[%s1623_s1 + $0x28] sm:$0xff] (!%p162_p10)  ;;  %v206_v20 = vld [vmem:[%s1623_s1 + $0x30] sm:$0xff] (!%p162_p10)  ;;  %234 = vst.msk [vmem:[#allocation2 + $0x8] sm:$0xff] (!%p162_p10), %vm219_vm1, %v1252_v0  ;;  %s186_s10 = sand.u32 (!%p162_p10), 1, %s1234_s13   ;;  %s1075_s19 = smul.u32 (!%p162_p10), 768, %s1242_s15 }
  0x12   : > { %v207_v21 = vld [vmem:[%s1623_s1 + $0x38] sm:$0xff] (!%p162_p10)  ;;  %v208_v22 = vld [vmem:[%s1623_s1 + $0x40] sm:$0xff] (!%p162_p10)  ;;  %v209_v23 = vld [vmem:[%s1623_s1 + $0x48] sm:$0xff] (!%p162_p10)  ;;  %235 = vst.msk [vmem:[#allocation2 + $0x10] sm:$0xff] (!%p162_p10), %vm219_vm1, %v1252_v0  ;;  %s1073_s11 = smul.u32 (!%p162_p10), 48, %s186_s10 }
  0x13   : > { %v210_v24 = vld [vmem:[%s1623_s1 + $0x50] sm:$0xff] (!%p162_p10)  ;;  %236 = vst.msk [vmem:[#allocation2 + $0x18] sm:$0xff] (!%p162_p10), %vm219_vm1, %v1252_v0 }
  0x14   : > { %s188_s18 = scalar_lea.vmem (!%p162_p10), [#allocation3], %s1073_s11 }
  0x15   : > { %s933_s21 = sshll.u32 (!%p162_p10), %s188_s18, 4  ;;  %s1567_s21 = int_to_ptr.vmem [resolvable:$true] %s933_s21 }
  0x16   : > { %s191_s26 = scalar_select %p190_p11, %s1242_s15, 1 }
  0x17   : > { %s1572_s15 = scalar_lea.hbm %s1625_s3, %s1075_s19  ;;  %s1172_s28 = scalar_lea.vmem %s1567_s21, 768 }
  0x18   : > { %s1074_s27 = smul.u32 48, %s191_s26  ;;  %p1173_p12 = scmp.ne.s32.totalorder %s1567_s21, %s1172_s28 }
  0x1a   : > { %s197_s30 = scalar_lea.vmem %s1622_s0, %s1074_s27  ;;  %s1576_s27 = scalar_lea.sflag [#allocation4], %s186_s10 }
  0x1b   : > { %v238_v1 = vld [vmem:[%s197_s30 + $0x8] sm:$0xff]  ;;  %v240_v2 = vld [vmem:[%s197_s30 + $0x18] sm:$0xff]  ;;  %v237_v3 = vld [vmem:[%s197_s30] sm:$0xff]  ;;  %p1174_p13 = pnand %p1173_p12, %p1318_p4 }
  0x1c   : > { %v1043_v4 = vpack.c.bf16 %v240_v2, %v238_v1  ;;  %v239_v5 = vld [vmem:[%s197_s30 + $0x10] sm:$0xff]  ;;  %v242_v7 = vld [vmem:[%s197_s30 + $0x28] sm:$0xff]  ;;  %v241_v8 = vld [vmem:[%s197_s30 + $0x20] sm:$0xff] }
  0x1d   : > { %v1045_v6 = vpack.c.bf16 %v239_v5, %v237_v3  ;;  %p1175_p0 = pneg %p1174_p13 }
  0x1e   : > { %1044 = vmatprep.subr.bf16.mxu0 %v1043_v4  ;;  %1063 = vmatprep.subr.bf16.mxu1 %v1043_v4 }
  0x1f   : > { %1046 = vmatpush1.bf16.msra.mxu0 %v1045_v6  ;;  %1065 = vmatpush1.bf16.msra.mxu1 %v1045_v6 }
  0x20   : > { %296 = vmatprep.subr.mxu0 %v242_v7  ;;  %1064 = vmatprep.subr.mxu1 %v242_v7 }
  0x23   : > { %297 = vmatpush1.msra.mxu0 %v241_v8  ;;  %1066 = vmatpush1.msra.mxu1 %v241_v8 }
  0x24   : > { %1018 = vmatmul.mubr.msk.f32.vlgmr.msra.gmra.mrb[0].mxu0 %vm243_vm0, %v200_v9  ;;  %1029 = vmatmul.mubr.msk.f32.vlgmr.msra.gmra.mrb[0].mxu1 %vm243_vm0, %v211_v10 }
  0x25   : > { %362 = vmatprep.mubr.f32.mxu0 %v1252_v0  ;;  %428 = vmatprep.mubr.f32.mxu1 %v1252_v0 }
  0x28   : > { %1019 = vmatmul.mubr.msk.f32.gmra.mrb[2].mxu0 %vm243_vm0, %v201_v11  ;;  %1030 = vmatmul.mubr.msk.f32.gmra.mrb[2].mxu1 %vm243_vm0, %v212_v12 }
  0x29   : > { %368 = vmatprep.mubr.f32.mxu0 %v1252_v0  ;;  %434 = vmatprep.mubr.f32.mxu1 %v1252_v0 }
  0x2c   : > { %1020 = vmatmul.mubr.msk.f32.gmra.mrb[4].mxu0 %vm243_vm0, %v202_v13  ;;  %1031 = vmatmul.mubr.msk.f32.gmra.mrb[4].mxu1 %vm243_vm0, %v213_v14 }
  0x2d   : > { %374 = vmatprep.mubr.f32.mxu0 %v1252_v0  ;;  %440 = vmatprep.mubr.f32.mxu1 %v1252_v0 }
  0x30   : > { %1021 = vmatmul.mubr.msk.f32.gmra.mrb[6].mxu0 %vm243_vm0, %v203_v15  ;;  %1032 = vmatmul.mubr.msk.f32.gmra.mrb[6].mxu1 %vm243_vm0, %v214_v16 }
  0x31   : > { %380 = vmatprep.mubr.f32.mxu0 %v1252_v0  ;;  %446 = vmatprep.mubr.f32.mxu1 %v1252_v0 }
  0x34   : > { %1022 = vmatmul.mubr.msk.f32.gmra.mrb[8].mxu0 %vm243_vm0, %v204_v17  ;;  %1033 = vmatmul.mubr.msk.f32.gmra.mrb[8].mxu1 %vm243_vm0, %v215_v18 }
  0x35   : > { %386 = vmatprep.mubr.f32.mxu0 %v1252_v0  ;;  %773 = vmatprep.mubr.f32.mxu1 %v1252_v0 }
  0x38   : > { %1023 = vmatmul.mubr.msk.f32.gmra.mrb[10].mxu0 %vm243_vm0, %v205_v19 }
  0x39   : > { %392 = vmatprep.mubr.f32.mxu0 %v1252_v0 }
  0x3c   : > { %1024 = vmatmul.mubr.msk.f32.gmra.mrb[12].mxu0 %vm243_vm0, %v206_v20 }
  0x3d   : > { %398 = vmatprep.mubr.f32.mxu0 %v1252_v0 }
  0x40   : > { %1025 = vmatmul.mubr.msk.f32.gmra.mrb[14].mxu0 %vm243_vm0, %v207_v21 }
  0x41   : > { %404 = vmatprep.mubr.f32.mxu0 %v1252_v0 }
  0x44   : > { %1026 = vmatmul.mubr.msk.f32.gmra.mrb[16].mxu0 %vm243_vm0, %v208_v22 }
  0x45   : > { %410 = vmatprep.mubr.f32.mxu0 %v1252_v0 }
  0x48   : > { %1027 = vmatmul.mubr.msk.f32.gmra.mrb[18].mxu0 %vm243_vm0, %v209_v23 }
  0x49   : > { %416 = vmatprep.mubr.f32.mxu0 %v1252_v0 }
  0x4c   : > { %1028 = vmatmul.mubr.msk.f32.gmra.mrb[20].mxu0 %vm243_vm0, %v210_v24 }
  0xf7   : > { %v424_v25 = vpop.f32.mrb[0].mxu1  ;;  %v1427_v26 = vpop.f32.mrb[0].mxu0 }
  0xf8   : > { %v475_v27 = vmul.f32 0.70710677, %v424_v25  ;;  %v426_v28 = vpop.f32.mrb[1].mxu1  ;;  %v1429_v29 = vpop.f32.mrb[1].mxu0  ;;  %v459_v50 = vmul.f32 0.5, %v424_v25 }
  0xf9   : > { %v476_v30 = vmul.f32 0.70710677, %v426_v28  ;;  %v460_v53 = vmul.f32 0.5, %v426_v28 }
  0xfa   : > { %1136 = verf.f32 %v475_v27 }
  0xfb   : > { %1138 = verf.f32 %v476_v30  ;;  %v430_v31 = vpop.f32.mrb[2].mxu1  ;;  %v1431_v32 = vpop.f32.mrb[2].mxu0 }
  0xfc   : > { %v477_v33 = vmul.f32 0.70710677, %v430_v31  ;;  %v432_v34 = vpop.f32.mrb[3].mxu1  ;;  %v1433_v35 = vpop.f32.mrb[3].mxu0  ;;  %v461_v1 = vmul.f32 0.5, %v430_v31 }
  0xfd   : > { %v478_v36 = vmul.f32 0.70710677, %v432_v34  ;;  %v462_v5 = vmul.f32 0.5, %v432_v34 }
  0xfe   : > { %1140 = verf.f32 %v477_v33 }
  0xff   : > { %1142 = verf.f32 %v478_v36  ;;  %v436_v37 = vpop.f32.mrb[4].mxu1  ;;  %v1435_v38 = vpop.f32.mrb[4].mxu0 }
 0x100   : > { %v479_v39 = vmul.f32 0.70710677, %v436_v37  ;;  %v438_v40 = vpop.f32.mrb[5].mxu1  ;;  %v1437_v41 = vpop.f32.mrb[5].mxu0  ;;  %v463_v14 = vmul.f32 0.5, %v436_v37 }
 0x101   : > { %v480_v42 = vmul.f32 0.70710677, %v438_v40  ;;  %v464_v17 = vmul.f32 0.5, %v438_v40 }
 0x102   : > { %1144 = verf.f32 %v479_v39 }
 0x103   : > { %1146 = verf.f32 %v480_v42  ;;  %v442_v43 = vpop.f32.mrb[6].mxu1  ;;  %v376_v44 = vpop.f32.mrb[6].mxu0 }
 0x104   : > { %v1137_v45 = vpop.eup %1136  ;;  %v481_v46 = vmul.f32 0.70710677, %v442_v43  ;;  %v444_v47 = vpop.f32.mrb[7].mxu1  ;;  %v465_v27 = vmul.f32 0.5, %v442_v43 }
 0x105   : > { %v378_v48 = vpop.f32.mrb[7].mxu0  ;;  %v1139_v49 = vpop.eup %1138  ;;  %v482_v51 = vmul.f32 0.70710677, %v444_v47  ;;  %v507_v52 = vadd.f32 1.0, %v1137_v45  ;;  %v466_v31 = vmul.f32 0.5, %v444_v47 }
 0x106   : > { %1148 = verf.f32 %v481_v46  ;;  %v508_v54 = vadd.f32 1.0, %v1139_v49 }
 0x107   : > { %1150 = verf.f32 %v482_v51  ;;  %v523_v55 = vmul.f32 %v507_v52, %v459_v50  ;;  %v448_v56 = vpop.f32.mrb[8].mxu1  ;;  %v382_v57 = vpop.f32.mrb[8].mxu0 }
 0x108   : > { %v1141_v58 = vpop.eup %1140  ;;  %v483_v59 = vmul.f32 0.70710677, %v448_v56  ;;  %v524_v60 = vmul.f32 %v508_v54, %v460_v53  ;;  %v450_v61 = vpop.f32.mrb[9].mxu1  ;;  %v467_v45 = vmul.f32 0.5, %v448_v56 }
 0x109   : > { %v384_v62 = vpop.f32.mrb[9].mxu0  ;;  %v1143_v63 = vpop.eup %1142  ;;  %v1439_v2 = vmul.f32 %v523_v55, %v376_v44  ;;  %v484_v3 = vmul.f32 0.70710677, %v450_v61  ;;  %v509_v4 = vadd.f32 1.0, %v1141_v58  ;;  %v468_v49 = vmul.f32 0.5, %v450_v61 }
 0x10a   : > { %1152 = verf.f32 %v483_v59  ;;  %v1441_v6 = vmul.f32 %v524_v60, %v378_v48  ;;  %v510_v7 = vadd.f32 1.0, %v1143_v63 }
 0x10b   : > { %1154 = verf.f32 %v484_v3  ;;  %v525_v8 = vmul.f32 %v509_v4, %v461_v1  ;;  %v388_v9 = vpop.f32.mrb[10].mxu0 }
 0x10c   : > { %v1145_v10 = vpop.eup %1144  ;;  %v526_v11 = vmul.f32 %v510_v7, %v462_v5  ;;  %v390_v12 = vpop.f32.mrb[11].mxu0  ;;  %v1460_v5 = vld [vmem:[%s1624_s2 + $0x10] sm:$0xff]  ;;  %v1465_v7 = vld [vmem:[%s1624_s2 + $0x8] sm:$0xff] }
 0x10d   : > { %v1147_v13 = vpop.eup %1146  ;;  %v541_v15 = vmul.f32 %v525_v8, %v382_v57  ;;  %v511_v16 = vadd.f32 1.0, %v1145_v10 }
 0x10e   : > { %v542_v18 = vmul.f32 %v526_v11, %v384_v62  ;;  %v512_v19 = vadd.f32 1.0, %v1147_v13  ;;  %v1453_v62 = vld [vmem:[%s1624_s2] sm:$0xff] }
 0x10f   : > { %577 = vrot.lane.b32.xlu1 %v541_v15, %s1253_s29  ;;  %v527_v20 = vmul.f32 %v511_v16, %v463_v14  ;;  %v394_v21 = vpop.f32.mrb[12].mxu0 }
 0x110   : > { %v1149_v22 = vpop.eup %1148  ;;  %557 = vrot.lane.b32.xlu0 %v542_v18, %s1253_s29  ;;  %v528_v23 = vmul.f32 %v512_v19, %v464_v17  ;;  %v396_v24 = vpop.f32.mrb[13].mxu0 }
 0x111   : > { %v1151_v25 = vpop.eup %1150  ;;  %v543_v28 = vmul.f32 %v527_v20, %v388_v9  ;;  %v513_v30 = vadd.f32 1.0, %v1149_v22 }
 0x112   : > { %v544_v33 = vmul.f32 %v528_v23, %v390_v12  ;;  %v514_v34 = vadd.f32 1.0, %v1151_v25 }
 0x113   : > { %579 = vrot.lane.b32.xlu1 %v543_v28, %s1253_s29  ;;  %v529_v36 = vmul.f32 %v513_v30, %v465_v27  ;;  %v400_v37 = vpop.f32.mrb[14].mxu0 }
 0x114   : > { %v1153_v39 = vpop.eup %1152  ;;  %559 = vrot.lane.b32.xlu0 %v544_v33, %s1253_s29  ;;  %v530_v40 = vmul.f32 %v514_v34, %v466_v31  ;;  %v402_v42 = vpop.f32.mrb[15].mxu0 }
 0x115   : > { %v1155_v44 = vpop.eup %1154  ;;  %v545_v46 = vmul.f32 %v529_v36, %v394_v21  ;;  %v515_v48 = vadd.f32 1.0, %v1153_v39 }
 0x116   : > { %v546_v43 = vmul.f32 %v530_v40, %v396_v24  ;;  %v516_v50 = vadd.f32 1.0, %v1155_v44 }
 0x117   : > { %v531_v51 = vmul.f32 %v515_v48, %v467_v45  ;;  %v406_v47 = vpop.f32.mrb[16].mxu0 }
 0x118   : > { %v532_v52 = vmul.f32 %v516_v50, %v468_v49  ;;  %v469_v53 = vmul.f32 0.70710677, %v406_v47  ;;  %561 = vrot.lane.b32.xlu0 %v546_v43, %s1253_s29  ;;  %v408_v54 = vpop.f32.mrb[17].mxu0  ;;  %v453_v8 = vmul.f32 0.5, %v406_v47 }
 0x119   : > { %v547_v55 = vmul.f32 %v531_v51, %v400_v37  ;;  %v470_v57 = vmul.f32 0.70710677, %v408_v54  ;;  %v454_v10 = vmul.f32 0.5, %v408_v54 }
 0x11a   : > { %v548_v58 = vmul.f32 %v532_v52, %v402_v42  ;;  %1156 = verf.f32 %v469_v53 }
 0x11b   : > { %1158 = verf.f32 %v470_v57  ;;  %v412_v59 = vpop.f32.mrb[18].mxu0 }
 0x11c   : > { %v471_v60 = vmul.f32 0.70710677, %v412_v59  ;;  %581 = vrot.lane.b32.xlu0 %v545_v46, %s1253_s29  ;;  %563 = vrot.lane.b32.xlu1 %v548_v58, %s1253_s29  ;;  %v414_v56 = vpop.f32.mrb[19].mxu0  ;;  %v455_v15 = vmul.f32 0.5, %v412_v59  ;;  %v646_v58 = vmul.f32 %v1441_v6, %v1441_v6 }
 0x11d   : > { %v472_v61 = vmul.f32 0.70710677, %v414_v56  ;;  %v456_v18 = vmul.f32 0.5, %v414_v56 }
 0x11e   : > { %1160 = verf.f32 %v471_v60 }
 0x11f   : > { %1162 = verf.f32 %v472_v61  ;;  %v418_v63 = vpop.f32.mrb[20].mxu0 }
 0x120   : > { %v473_v1 = vmul.f32 0.70710677, %v418_v63  ;;  %696 = vrot.lane.b32.xlu0 %v1453_v62, %s1254_s5  ;;  %583 = vrot.lane.b32.xlu1 %v547_v55, %s1253_s29  ;;  %v420_v3 = vpop.f32.mrb[21].mxu0  ;;  %v457_v25 = vmul.f32 0.5, %v418_v63  ;;  %v223_v63 = vsel %vm219_vm1, %v1465_v7, 0.0  ;;  %s1255_s29 = smov [#allocation3]  }
 0x121   : > { %v474_v4 = vmul.f32 0.70710677, %v420_v3  ;;  %v458_v30 = vmul.f32 0.5, %v420_v3  ;;  %v220_v3 = vsel %vm219_vm1, %v1453_v62, 0.0  ;;  %s1176_s30 = sshll.u32 %s1255_s29, 4  ;;  %s1177_s30 = int_to_ptr.vmem [resolvable:$false] %s1176_s30 }
 0x122   : > { %1164 = verf.f32 %v473_v1  ;;  %v226_v1 = vsel %vm219_vm1, %v1460_v5, 0.0  ;;  %s1178_s4 = scalar_lea.vmem %s1177_s30, 1536  ;;  %p1179_p1 = scmp.lt.s32.totalorder %s1567_s21, %s1177_s30 }
 0x123   : > { %1166 = verf.f32 %v474_v4  ;;  %v549_v4 = vld [vmem:[#allocation2] sm:$0xff]  ;;  %p1180_p2 = scmp.lt.s32.totalorder %s1178_s4, %s1172_s28 }
 0x124   : > { %v1157_v9 = vpop.eup %1156  ;;  %700 = vrot.lane.b32.xlu0 %v1460_v5, %s1254_s5  ;;  %698 = vrot.lane.b32.xlu1 %v1465_v7, %s1254_s5 }
 0x125   : > { %v1159_v11 = vpop.eup %1158  ;;  %v501_v12 = vadd.f32 1.0, %v1157_v9  ;;  %p1181_p3 = por %p1180_p2, %p1179_p1 }
 0x126   : > { %v502_v13 = vadd.f32 1.0, %v1159_v11 }
 0x127   : > { %v517_v14 = vmul.f32 %v501_v12, %v453_v8  ;;  %p1182_p5 = pnand %p1181_p3, %p1175_p0 }
 0x128   : > { %v1161_v16 = vpop.eup %1160  ;;  %v518_v17 = vmul.f32 %v502_v13, %v454_v10  ;;  %v550_v10 = vld [vmem:[#allocation2 + $0x8] sm:$0xff] }
 0x129   : > { %v1163_v19 = vpop.eup %1162  ;;  %v1470_v20 = vmul.f32 %v517_v14, %v1427_v26  ;;  %v503_v21 = vadd.f32 1.0, %v1161_v16 }
 0x12a   : > { %v1473_v22 = vmul.f32 %v518_v17, %v1429_v29  ;;  %v504_v23 = vadd.f32 1.0, %v1163_v19 }
 0x12b   : > { %v519_v24 = vmul.f32 %v503_v21, %v455_v15  ;;  %v639_v36 = vmul.f32 %v1470_v20, %v1470_v20 }
 0x12c   : > { %v1165_v27 = vpop.eup %1164  ;;  %v520_v28 = vmul.f32 %v504_v23, %v456_v18  ;;  %v640_v26 = vmul.f32 %v1473_v22, %v1473_v22 }
 0x12d   : > { %v1167_v31 = vpop.eup %1166  ;;  %v1476_v33 = vmul.f32 %v519_v24, %v1431_v32  ;;  %v505_v34 = vadd.f32 1.0, %v1165_v27  ;;  %v551_v27 = vld [vmem:[#allocation2 + $0x10] sm:$0xff] }
 0x12e   : > { %v1483_v29 = vmul.f32 %v520_v28, %v1433_v35  ;;  %v506_v37 = vadd.f32 1.0, %v1167_v31 }
 0x12f   : > { %v601_v39 = vadd.f32 %v1476_v33, %v1470_v20  ;;  %v641_v40 = vmul.f32 %v1476_v33, %v1476_v33  ;;  %v521_v42 = vmul.f32 %v505_v34, %v457_v25  ;;  %v1057_v32 = vpack.c.bf16 %v1476_v33, %v1470_v20 }
 0x130   : > { %v610_v44 = vadd.f32 %v1483_v29, %v1473_v22  ;;  %v642_v45 = vmul.f32 %v1483_v29, %v1483_v29  ;;  %v522_v46 = vmul.f32 %v506_v37, %v458_v30  ;;  %v1055_v35 = vpack.c.bf16 %v1483_v29, %v1473_v22  ;;  %v552_v37 = vld [vmem:[#allocation2 + $0x18] sm:$0xff] }
 0x131   : > { %v647_v48 = vadd.f32 %v641_v40, %v639_v36  ;;  %v1498_v49 = vmul.f32 %v521_v42, %v1435_v38 }
 0x132   : > { %v656_v43 = vadd.f32 %v642_v45, %v640_v26  ;;  %v1501_v50 = vmul.f32 %v522_v46, %v1437_v41  ;;  %v645_v41 = vmul.f32 %v1439_v2, %v1439_v2 }
 0x133   : > { %v602_v51 = vadd.f32 %v601_v39, %v1498_v49  ;;  %v643_v47 = vmul.f32 %v1498_v49, %v1498_v49  ;;  %v1061_v52 = vpack.c.bf16 %v1439_v2, %v1498_v49 }
 0x134   : > { %v611_v53 = vadd.f32 %v610_v44, %v1501_v50  ;;  %v644_v54 = vmul.f32 %v1501_v50, %v1501_v50  ;;  %v1059_v38 = vpack.c.bf16 %v1441_v6, %v1501_v50 }
 0x135   : > { %v603_v55 = vadd.f32 %v602_v51, %v1439_v2  ;;  %v648_v57 = vadd.f32 %v647_v48, %v643_v47 }
 0x136   : > { %v612_v59 = vadd.f32 %v611_v53, %v1441_v6  ;;  %v657_v60 = vadd.f32 %v656_v43, %v644_v54 }
 0x137   : > { %v649_v56 = vadd.f32 %v648_v57, %v645_v41  ;;  %v604_v36 = vrot.slane %v603_v55, 4 }
 0x138   : > { %v658_v61 = vadd.f32 %v657_v60, %v646_v58  ;;  %v613_v26 = vrot.slane %v612_v59, 4 }
 0x139   : > { %v650_v39 = vrot.slane %v649_v56, 4  ;;  %v605_v45 = vadd.f32 %v604_v36, %v603_v55 }
 0x13a   : > { %v659_v40 = vrot.slane %v658_v61, 4  ;;  %v614_v46 = vadd.f32 %v613_v26, %v612_v59 }
 0x13b   : > { %v651_v41 = vadd.f32 %v650_v39, %v649_v56  ;;  %v606_v59 = vrot.slane %v605_v45, 2 }
 0x13c   : > { %v660_v57 = vadd.f32 %v659_v40, %v658_v61 }
 0x143   : > { %224 = vadd.xlane.f32.xlu0 %v223_v63 }
 0x147   : > { %227 = vadd.xlane.f32.xlu0 %v226_v1  ;;  %v615_v1 = vrot.slane %v614_v46, 2 }
 0x148   : > { %221 = vadd.xlane.f32.xlu1 %v220_v3 }
 0x181   : > { %v578_v8 = vpop.permute.xlu1 %577 }
 0x182   : > { %v558_v9 = vpop.permute.xlu0 %557  ;;  %v597_v11 = vsel %vm219_vm1, %v549_v4, %v578_v8 }
 0x183   : > { %569 = vst.msk [vmem:[#allocation2] sm:$0xff] %vm219_vm1, %v558_v9  ;;  %v585_v12 = vsel %vm219_vm1, %v578_v8, %v558_v9  ;;  %v665_v16 = vmul.f32 %v597_v11, %v597_v11 }
 0x184   : > { %v666_v21 = vmul.f32 %v585_v12, %v585_v12 }
 0x185   : > { %v580_v13 = vpop.permute.xlu1 %579 }
 0x186   : > { %v598_v14 = vsel %vm219_vm1, %v550_v10, %v580_v13  ;;  %v560_v15 = vpop.permute.xlu0 %559 }
 0x187   : > { %v619_v17 = vadd.f32 %v598_v14, %v597_v11  ;;  %v667_v18 = vmul.f32 %v598_v14, %v598_v14  ;;  %570 = vst.msk [vmem:[#allocation2 + $0x8] sm:$0xff] %vm219_vm1, %v560_v15  ;;  %v586_v19 = vsel %vm219_vm1, %v580_v13, %v560_v15  ;;  %v1049_v30 = vpack.c.bf16 %v598_v14, %v597_v11 }
 0x188   : > { %v628_v23 = vadd.f32 %v586_v19, %v585_v12  ;;  %v668_v24 = vmul.f32 %v586_v19, %v586_v19  ;;  %v1047_v25 = vpack.c.bf16 %v586_v19, %v585_v12  ;;  %v652_v11 = vrot.slane %v651_v41, 2 }
 0x189   : > { %v673_v28 = vadd.f32 %v667_v18, %v665_v16  ;;  %v661_v12 = vrot.slane %v660_v57, 2  ;;  %v616_v18 = vadd.f32 %v615_v1, %v614_v46 }
 0x18a   : > { %v682_v31 = vadd.f32 %v668_v24, %v666_v21  ;;  %1048 = vmatprep.subr.bf16.mxu1 %v1047_v25  ;;  %v562_v34 = vpop.permute.xlu0 %561 }
 0x18b   : > { %571 = vst.msk [vmem:[#allocation2 + $0x10] sm:$0xff] %vm219_vm1, %v562_v34  ;;  %1050 = vmatpush1.bf16.msra.mxu1 %v1049_v30 }
 0x18e   : > { %v582_v42 = vpop.permute.xlu0 %581  ;;  %v564_v44 = vpop.permute.xlu1 %563 }
 0x18f   : > { %v587_v48 = vsel %vm219_vm1, %v582_v42, %v562_v34  ;;  %v599_v43 = vsel %vm219_vm1, %v551_v27, %v582_v42  ;;  %572 = vst.msk [vmem:[#allocation2 + $0x18] sm:$0xff] %vm219_vm1, %v564_v44  ;;  %v662_v27 = vadd.f32 %v661_v12, %v660_v57 }
 0x190   : > { %v620_v51 = vadd.f32 %v619_v17, %v599_v43  ;;  %v629_v47 = vadd.f32 %v628_v23, %v587_v48  ;;  %v669_v53 = vmul.f32 %v599_v43, %v599_v43  ;;  %v670_v54 = vmul.f32 %v587_v48, %v587_v48 }
 0x191   : > { %v607_v17 = vadd.f32 %v606_v59, %v605_v45 }
 0x192   : > { %v674_v58 = vadd.f32 %v673_v28, %v669_v53  ;;  %v683_v60 = vadd.f32 %v682_v31, %v670_v54  ;;  %v584_v63 = vpop.permute.xlu1 %583  ;;  %v697_v25 = vpop.permute.xlu0 %696  ;;  %v653_v28 = vadd.f32 %v652_v11, %v651_v41 }
 0x193   : > { %v588_v3 = vsel %vm219_vm1, %v584_v63, %v564_v44  ;;  %v600_v55 = vsel %vm219_vm1, %v552_v37, %v584_v63  ;;  %v608_v26 = vrot.slane %v607_v17, 1  ;;  %v617_v37 = vrot.slane %v616_v18, 1 }
 0x194   : > { %v621_v4 = vadd.f32 %v620_v51, %v600_v55  ;;  %v630_v8 = vadd.f32 %v629_v47, %v588_v3  ;;  %v671_v9 = vmul.f32 %v600_v55, %v600_v55  ;;  %v672_v10 = vmul.f32 %v588_v3, %v588_v3 }
 0x195   : > { %v1053_v13 = vpack.c.bf16 %v600_v55, %v599_v43  ;;  %v1051_v14 = vpack.c.bf16 %v588_v3, %v587_v48  ;;  %v654_v29 = vrot.slane %v653_v28, 1  ;;  %v609_v51 = vadd.f32 %v608_v26, %v607_v17 }
 0x196   : > { %v622_v15 = vrot.slane %v621_v4, 4  ;;  %v631_v56 = vrot.slane %v630_v8, 4  ;;  %v675_v61 = vadd.f32 %v674_v58, %v671_v9  ;;  %v684_v16 = vadd.f32 %v683_v60, %v672_v10  ;;  %v699_v22 = vpop.permute.xlu1 %698  ;;  %v701_v54 = vpop.permute.xlu0 %700 }
 0x197   : > { %1052 = vmatprep.subr.bf16.mxu1 %v1051_v14  ;;  %v618_v47 = vadd.f32 %v617_v37, %v616_v18  ;;  %v655_v6 = vadd.f32 %v654_v29, %v653_v28 }
 0x198   : > { %v623_v19 = vadd.f32 %v622_v15, %v621_v4  ;;  %v632_v21 = vadd.f32 %v631_v56, %v630_v8  ;;  %v676_v23 = vrot.slane %v675_v61, 4  ;;  %v685_v24 = vrot.slane %v684_v16, 4  ;;  %1054 = vmatpush1.bf16.msra.mxu1 %v1053_v13 }
 0x199   : > { %1056 = vmatprep.subr.bf16.mxu1 %v1055_v35  ;;  %v663_v35 = vrot.slane %v662_v27, 1 }
 0x19a   : > { %v624_v30 = vrot.slane %v623_v19, 2  ;;  %v633_v31 = vrot.slane %v632_v21, 2  ;;  %v677_v34 = vadd.f32 %v676_v23, %v675_v61  ;;  %v686_v36 = vadd.f32 %v685_v24, %v684_v16 }
 0x19b   : > { %1034 = vmatmul.mubr.msk.f32.vlgmr.msra.gmra.mrb[10].mxu1 %vm702_vm2, %v697_v25  ;;  %v664_v50 = vadd.f32 %v663_v35, %v662_v27 }
 0x19c   : > { %v625_v39 = vadd.f32 %v624_v30, %v623_v19  ;;  %v634_v40 = vadd.f32 %v633_v31, %v632_v21  ;;  %v678_v42 = vrot.slane %v677_v34, 2  ;;  %v687_v44 = vrot.slane %v686_v36, 2  ;;  %1058 = vmatpush1.bf16.msra.mxu1 %v1057_v32  ;;  %779 = vmatprep.mubr.f32.mxu1 %v1252_v0 }
 0x19d   : > { %1060 = vmatprep.subr.bf16.mxu1 %v1059_v38 }
 0x19e   : > { %v626_v45 = vrot.slane %v625_v39, 1  ;;  %v635_v46 = vrot.slane %v634_v40, 1  ;;  %v679_v48 = vadd.f32 %v678_v42, %v677_v34  ;;  %v688_v43 = vadd.f32 %v687_v44, %v686_v36 }
 0x19f   : > { %1035 = vmatmul.mubr.msk.f32.gmra.mrb[12].mxu1 %vm702_vm2, %v699_v22 }
 0x1a0   : > { %v627_v53 = vadd.f32 %v626_v45, %v625_v39  ;;  %v636_v20 = vadd.f32 %v635_v46, %v634_v40  ;;  %v680_v33 = vrot.slane %v679_v48, 1  ;;  %v689_v32 = vrot.slane %v688_v43, 1  ;;  %1062 = vmatpush1.bf16.msra.mxu1 %v1061_v52  ;;  %785 = vmatprep.mubr.f32.mxu1 %v1252_v0 }
 0x1a2   : > { %v681_v38 = vadd.f32 %v680_v33, %v679_v48  ;;  %v690_v41 = vadd.f32 %v689_v32, %v688_v43  ;;  %v637_v57 = vadd.f32 %v627_v53, %v609_v51  ;;  %v638_v58 = vadd.f32 %v636_v20, %v618_v47 }
 0x1a3   : > { %1036 = vmatmul.mubr.msk.f32.gmra.mrb[14].mxu1 %vm702_vm2, %v701_v54 }
 0x1a4   : > { %v691_v60 = vadd.f32 %v681_v38, %v655_v6  ;;  %v692_v63 = vadd.f32 %v690_v41, %v664_v50  ;;  %862 = vmatprep.mubr.f32.mxu1 %v1252_v0  ;;  %v881_v1 = vmul.f32 0.015625, %v637_v57  ;;  %v882_v3 = vmul.f32 0.015625, %v638_v58 }
 0x1a6   : > { %v883_v2 = vmul.f32 0.015625, %v691_v60  ;;  %v884_v49 = vmul.f32 0.015625, %v692_v63  ;;  %v885_v52 = vmul.f32 %v881_v1, %v881_v1  ;;  %v886_v55 = vmul.f32 %v882_v3, %v882_v3 }
 0x1a7   : > { %1037 = vmatmul.mubr.msk.f32.vlgmr.msra.gmra.mrb[10].mxu1 %vm702_vm2, %v1453_v62 }
 0x1a8   : > { %868 = vmatprep.mubr.f32.mxu1 %v1252_v0  ;;  %v887_v59 = vsub.f32 %v883_v2, %v885_v52  ;;  %v888_v4 = vsub.f32 %v884_v49, %v886_v55 }
 0x1aa   : > { %v889_v8 = vmax.f32 %v887_v59, 1e-05  ;;  %v890_v9 = vmax.f32 %v888_v4, 1e-05 }
 0x1ab   : > { %1038 = vmatmul.mubr.msk.f32.gmra.mrb[12].mxu1 %vm702_vm2, %v1465_v7 }
 0x1ac   : > { %874 = vmatprep.mubr.f32.mxu1 %v1252_v0  ;;  %1168 = vrsqrt.f32 %v889_v8 }
 0x1ad   : > { %1170 = vrsqrt.f32 %v890_v9 }
 0x1af   : > { %1039 = vmatmul.mubr.msk.f32.gmra.mrb[14].mxu1 %vm702_vm2, %v1460_v5 }
 0x1b6   : > { %v1169_v7 = vpop.eup %1168 }
 0x1b7   : > { %v1171_v0 = vpop.eup %1170 }
 0x1d0   : > { %v225_v11 = vpop.xlane.xlu0 %224 }
 0x1d1   : > { %v895_v61 = vmul.f32 %v881_v1, %v225_v11  ;;  %v896_v16 = vmul.f32 %v882_v3, %v225_v11 }
 0x1d4   : > { %v228_v17 = vpop.xlane.xlu0 %227 }
 0x1d5   : > { %v222_v10 = vpop.xlane.xlu1 %221  ;;  %v897_v25 = vmul.f32 %v881_v1, %v228_v17  ;;  %v898_v28 = vmul.f32 %v882_v3, %v228_v17 }
 0x1d6   : > { %v893_v62 = vmul.f32 %v881_v1, %v222_v10  ;;  %v894_v12 = vmul.f32 %v882_v3, %v222_v10 }
 0x27a   : > { %v864_v13 = vpop.f32.mrb[10].mxu1 }
 0x27b   : > { %v899_v14 = vsub.f32 %v864_v13, %v893_v62  ;;  %v866_v15 = vpop.f32.mrb[11].mxu1 }
 0x27c   : > { %v900_v56 = vsub.f32 %v866_v15, %v894_v12 }
 0x27d   : > { %v905_v5 = vmul.f32 %v1169_v7, %v899_v14 }
 0x27e   : > { %v906_v18 = vmul.f32 %v1171_v0, %v900_v56  ;;  %v870_v19 = vpop.f32.mrb[12].mxu1 }
 0x27f   : > { %911 = vst [vmem:[%s188_s18] sm:$0xff] %v905_v5  ;;  %v901_v21 = vsub.f32 %v870_v19, %v895_v61  ;;  %v872_v23 = vpop.f32.mrb[13].mxu1 }
 0x280   : > { %912 = vst [vmem:[%s188_s18 + $0x8] sm:$0xff] %v906_v18  ;;  %v902_v24 = vsub.f32 %v872_v23, %v896_v16 }
 0x281   : > { %v907_v27 = vmul.f32 %v1169_v7, %v901_v21 }
 0x282   : > { %v908_v30 = vmul.f32 %v1171_v0, %v902_v24  ;;  %v876_v31 = vpop.f32.mrb[14].mxu1 }
 0x283   : > { %913 = vst [vmem:[%s188_s18 + $0x10] sm:$0xff] %v907_v27  ;;  %v903_v34 = vsub.f32 %v876_v31, %v897_v25  ;;  %v878_v36 = vpop.f32.mrb[15].mxu1 }
 0x284   : > { %914 = vst [vmem:[%s188_s18 + $0x18] sm:$0xff] %v908_v30  ;;  %v904_v26 = vsub.f32 %v878_v36, %v898_v28 }
 0x285   : > { %v909_v37 = vmul.f32 %v1169_v7, %v903_v34 }
 0x286   : > { %v910_v39 = vmul.f32 %v1171_v0, %v904_v26 }
 0x287   : > { %915 = vst [vmem:[%s188_s18 + $0x20] sm:$0xff] %v909_v37 }
 0x288   : > { %916 = vst [vmem:[%s188_s18 + $0x28] sm:$0xff] %v910_v39 }
 0x289   : > { %1185 = shalt.err (!%p1182_p5)
}
 0x28a   : > { %s1186_s5 = scalar_lea.hbm %s1572_s15, 768  ;;  %s1190_s8 = scalar_lea.hbm %s1625_s3, 1536 }
 0x28b   : > { %p1187_p6 = scmp.ne.s32.totalorder %s1572_s15, %s1186_s5  ;;  %p1191_p10 = scmp.lt.u32.totalorder %s1572_s15, %s1625_s3 }
 0x28c   : > { %p1192_p11 = scmp.lt.u32.totalorder %s1190_s8, %s1186_s5  ;;  %p1194_p13 = scmp.lt.u32.totalorder %s1186_s5, %s1572_s15 }
 0x28d   : > { %p1188_p7 = pnand %p1187_p6, %p1318_p4 }
 0x28e   : > { %p1193_p12 = por %p1192_p11, %p1191_p10 }
 0x28f   : > { %p1189_p9 = pneg %p1188_p7 }
 0x290   : > { %p1195_p0 = por %p1194_p13, %p1193_p12 }
 0x292   : > { %p1196_p1 = pnand %p1195_p0, %p1189_p9 }
 0x294   : > { %1199 = shalt.err (!%p1196_p1)
}
 0x295   : > { %s1256_s11 = smov 256   ;;  %s1257_s18 = smov 16  }
 0x296   : > { %1076 = dma.vmem_to_hbm [thread:$0]  (%p1318_p4), %s1567_s21, 768, %s1572_s15, %s1576_s27, %s1256_s11, %s1256_s11, %s1257_s18  }
 0x297 PF: > { %p1082_p2 = scmp.ge.s32.totalorder %s1250_s17, 2  ;;  %s948_s19 = sand.u32 1, %s1230_s12  }
 0x298   : > { %s949_s23 = scalar_lea.sflag [#allocation4], %s948_s19 }
 0x299   : > { %p1079_p3 = pnand %p1082_p2, %p1325_p8 }
 0x29b   : > { %1225 = dma.done.wait (!%p1079_p3), %s949_s23, 768  }
 0x29c   : > { %1227 = vsyncadd (!%p1079_p3), %s949_s23, 4294966528  ;;  %s16_s17 = sadd.s32 1, %s1250_s17   ;;  %s1628_s12 = smov %s1234_s13 }
 0x29d   : > { %p13_p5 = scmp.ge.s32.totalorder %s16_s17, 4   ;;  %s1629_s13 = smov %s1238_s14 }
 0x29e   : > { %s1630_s14 = smov %s1331_s25  ;;  %s1631_s15 = smov %s1246_s16 }
 0x29f   : > { %s1632_s16 = smov %s1634_s20  ;;  %15 = sbr.rel (!%p13_p5) target bundleno = 4 (0x4), region = 71 }
 0x2a6   :  { %954 = vsyncpa [#allocation4], 1 }
 0x2a7   :  { %956 = vsyncpa [#allocation4 + $0x1], 1 }

</bundles_post_ra>
